<compile_context>
chip_gen: v7x
topology: tpu7x:2x2x1
jax: 0.10.0
libtpu: 0.0.40
codegen_flags: <defaults>
</compile_context>

<pallas_src>
import functools

import jax
import jax.numpy as jnp
from jax.experimental import pallas as pl
from jax.experimental.pallas import tpu as pltpu


def _gelu_tanh(x):
    # tanh-approx GELU (EUP-friendly on TPU).
    # TODO(synk): switch to exact erf-GELU if MlpCoords uses torch.nn.GELU(exact).
    c = 0.7978845608028654  # sqrt(2/pi)
    return 0.5 * x * (1.0 + jnp.tanh(c * (x + 0.044715 * x * x * x)))


def _mlp_mse_kernel(x_ref, t_ref, w1t_ref, b1_ref, w2t_ref, b2_ref,
                    w3t_ref, b3_ref, o_ref, acc_ref, *, n_valid, tile, steps):
    c = pl.program_id(0)   # core-split axis ("parallel")
    s = pl.program_id(1)   # point-tile axis within this core ("arbitrary")

    @pl.when(s == 0)
    def _():
        acc_ref[...] = jnp.zeros_like(acc_ref)

    x = x_ref[...]                       # (2, tile)  lane-dense points
    w1t = w1t_ref[...]                   # (H, 2)

    # layer 1: K=2 is too small for the MXU -> two VPU broadcast-FMAs.
    h = (w1t[:, 0:1] * x[0:1, :]
         + w1t[:, 1:2] * x[1:2, :]
         + b1_ref[...])                  # (H, tile)
    h = _gelu_tanh(h)

    # layer 2: (H, H) @ (H, tile) on the MXU, lane-dense output.
    h = jnp.dot(w2t_ref[...], h, preferred_element_type=jnp.float32) + b2_ref[...]
    h = _gelu_tanh(h)

    # layer 3: (3, H) @ (H, tile) -> predicted coords, lane-dense.
    y = jnp.dot(w3t_ref[...], h, preferred_element_type=jnp.float32) + b3_ref[...]

    # residual = data_3d - predicted ; accumulate squared error elementwise
    # (mask out the zero-padded tail of the point axis).
    r = t_ref[...] - y                   # (3, tile)
    col = (c * steps + s) * tile + jax.lax.broadcasted_iota(jnp.int32, (1, tile), 1)
    acc_ref[...] += jnp.where(col < n_valid, r * r, 0.0)

    # single reduction + output write, deferred to the last step of this core.
    @pl.when(s == steps - 1)
    def _():
        o_ref[...] = jnp.broadcast_to(jnp.sum(acc_ref[...]), (1, 1, 1))


def lifting_debug_loss(pose_2d, pose_3d, params, *, tile=2048, n_cores=2):
    """Forward pass of LiftingSupervisedDebugModel (is_train path) -> scalar loss."""
    # process_data's permute(0,3,2,1) and MlpCoords' channel-last view cancel
    # for a point-wise MLP followed by a global mean, so we flatten the points
    # directly (order-invariant) and put the point axis on the TPU lane axis.
    B, L, J, c_in = pose_2d.shape
    c_out = pose_3d.shape[-1]
    N = B * L * J
    denom = float(N * c_out)  # mean over residual of shape [B, 3, J, L]

    x = pose_2d.astype(jnp.float32).reshape(N, c_in).T     # (2, N)
    t = pose_3d.astype(jnp.float32).reshape(N, c_out).T    # (3, N)

    w1, b1, w2, b2, w3, b3 = params
    H = w1.shape[1]
    # lane-dense orientation: h = W^T @ X, biases as column vectors.
    w1t = w1.T.astype(jnp.float32)            # (H, 2)
    w2t = w2.T.astype(jnp.float32)            # (H, H)
    w3t = w3.T.astype(jnp.float32)            # (3, H)
    b1c = b1.reshape(H, 1).astype(jnp.float32)
    b2c = b2.reshape(H, 1).astype(jnp.float32)
    b3c = b3.reshape(c_out, 1).astype(jnp.float32)

    # Clamp the lane tile for tiny inputs, keep it a multiple of 128, and pad
    # the point axis up to n_cores * tile * steps (padded tail masked in-kernel).
    tile = max(128, (min(tile, pl.cdiv(N, 128) * 128) // 128) * 128)
    chunk = n_cores * tile
    n_total = pl.cdiv(N, chunk) * chunk
    if n_total != N:
        x = jnp.pad(x, ((0, 0), (0, n_total - N)))
        t = jnp.pad(t, ((0, 0), (0, n_total - N)))
    steps = n_total // chunk  # inner ("arbitrary") steps per core

    kernel = functools.partial(_mlp_mse_kernel, n_valid=N, tile=tile, steps=steps)
    partials = pl.pallas_call(
        kernel,
        out_shape=jax.ShapeDtypeStruct((n_cores, 1, 1), jnp.float32),
        grid_spec=pltpu.PrefetchScalarGridSpec(
            num_scalar_prefetch=0,
            grid=(n_cores, steps),
            in_specs=[
                pl.BlockSpec((c_in, tile), lambda c, s: (0, c * steps + s)),   # x
                pl.BlockSpec((c_out, tile), lambda c, s: (0, c * steps + s)),  # t
                pl.BlockSpec((H, c_in), lambda c, s: (0, 0)),                  # w1^T
                pl.BlockSpec((H, 1), lambda c, s: (0, 0)),                     # b1
                pl.BlockSpec((H, H), lambda c, s: (0, 0)),                     # w2^T
                pl.BlockSpec((H, 1), lambda c, s: (0, 0)),                     # b2
                pl.BlockSpec((c_out, H), lambda c, s: (0, 0)),                 # w3^T
                pl.BlockSpec((c_out, 1), lambda c, s: (0, 0)),                 # b3
            ],
            out_specs=pl.BlockSpec((1, 1, 1), lambda c, s: (c, 0, 0)),
            scratch_shapes=[pltpu.VMEM((c_out, tile), jnp.float32)],
        ),
        compiler_params=pltpu.CompilerParams(
            dimension_semantics=("parallel", "arbitrary")),
    )(x, t, w1t, b1c, w2t, b2c, w3t, b3c)

    return jnp.sum(partials) / denom


def _init_linear(key, fan_in, fan_out):
    # PyTorch nn.Linear default init: U(-1/sqrt(fan_in), 1/sqrt(fan_in))
    kw, kb = jax.random.split(key)
    bound = 1.0 / jnp.sqrt(fan_in)
    w = jax.random.uniform(kw, (fan_in, fan_out), jnp.float32, -bound, bound)
    b = jax.random.uniform(kb, (1, fan_out), jnp.float32, -bound, bound)
    return w, b


def _reference_loss(pose_2d, pose_3d, params):
    # Pure-JAX reference mirroring the PyTorch path (with the permutes).
    d2 = jnp.transpose(pose_2d, (0, 3, 2, 1)).astype(jnp.float32)
    d3 = jnp.transpose(pose_3d, (0, 3, 2, 1)).astype(jnp.float32)
    B, _, J, L = d3.shape
    x = jnp.transpose(d2, (0, 2, 3, 1)).reshape(B * J * L, 2)
    t = jnp.transpose(d3, (0, 2, 3, 1)).reshape(B * J * L, 3)
    w1, b1, w2, b2, w3, b3 = params
    h = _gelu_tanh(x @ w1 + b1)
    h = _gelu_tanh(h @ w2 + b2)
    y = h @ w3 + b3
    return jnp.mean((t - y) ** 2)


if __name__ == "__main__":
    # Small, consistent shapes:  B=2 clips, seq_len L=8 frames, J=16 joints,
    # n_input_coords=2, n_output_coords=3, hidden channels H=32.
    B, L, J, H = 2, 8, 16, 32

    key = jax.random.PRNGKey(0)
    k2d, k3d, k1, k2, k3 = jax.random.split(key, 5)

    # batch tensors as the dataloader would provide them: [B, L, J, C]
    pose_2d = jax.random.normal(k2d, (B, L, J, 2), jnp.float32)
    pose_3d = jax.random.normal(k3d, (B, L, J, 3), jnp.float32)

    # Deterministic MlpCoords parameters (2 -> H -> H -> 3).
    # TODO(synk): dropout inside MlpCoords assumed p_dropout=0 (no-op in this debug model).
    params = (*_init_linear(k1, 2, H),
              *_init_linear(k2, H, H),
              *_init_linear(k3, H, 3))

    loss = jax.block_until_ready(lifting_debug_loss(pose_2d, pose_3d, params))
    ref = jax.block_until_ready(_reference_loss(pose_2d, pose_3d, params))

    assert jnp.isfinite(loss), "loss is not finite"
    assert abs(float(loss) - float(ref)) < 1e-4 * max(1.0, abs(float(ref))), \
        f"mismatch: pallas={float(loss)} ref={float(ref)}"
    print("KERNEL_OK")
</pallas_src>

<mosaic_0001>
module attributes {stable_mosaic.version = 11 : i64} {
  func.func @_mlp_mse_kernel(%arg0: i32, %arg1: i32, %arg2: memref<2x256xf32, #tpu.memory_space<vmem>>, %arg3: memref<3x256xf32, #tpu.memory_space<vmem>>, %arg4: memref<32x2xf32, #tpu.memory_space<vmem>>, %arg5: memref<32x1xf32, #tpu.memory_space<vmem>>, %arg6: memref<32x32xf32, #tpu.memory_space<vmem>>, %arg7: memref<32x1xf32, #tpu.memory_space<vmem>>, %arg8: memref<3x32xf32, #tpu.memory_space<vmem>>, %arg9: memref<3x1xf32, #tpu.memory_space<vmem>>, %arg10: memref<1x1x1xf32, #tpu.memory_space<vmem>>, %arg11: memref<3x256xf32, #tpu.memory_space<vmem>>) attributes {dimension_semantics = [#tpu.dimension_semantics<parallel>, #tpu.dimension_semantics<arbitrary>], iteration_bounds = array<i64: 2, 1>, scalar_prefetch = 0 : i64, scratch_operands = 1 : i64, tpu.core_type = #tpu.core_type<tc>, window_params = [{transform_indices = @transform_0, window_bounds = array<i64: 2, 256>}, {transform_indices = @transform_1, window_bounds = array<i64: 3, 256>}, {pipeline_mode = #tpu.pipeline_mode<synchronous>, transform_indices = @transform_2, window_bounds = array<i64: 32, 2>}, {pipeline_mode = #tpu.pipeline_mode<synchronous>, transform_indices = @transform_3, window_bounds = array<i64: 32, 1>}, {pipeline_mode = #tpu.pipeline_mode<synchronous>, transform_indices = @transform_4, window_bounds = array<i64: 32, 32>}, {pipeline_mode = #tpu.pipeline_mode<synchronous>, transform_indices = @transform_5, window_bounds = array<i64: 32, 1>}, {pipeline_mode = #tpu.pipeline_mode<synchronous>, transform_indices = @transform_6, window_bounds = array<i64: 3, 32>}, {pipeline_mode = #tpu.pipeline_mode<synchronous>, transform_indices = @transform_7, window_bounds = array<i64: 3, 1>}, {transform_indices = @transform_8, window_bounds = array<i64: 1, 1, 1>}]} {
    %c0_i32 = arith.constant 0 : i32
    %0 = arith.cmpi eq, %arg1, %c0_i32 : i32
    %1 = arith.extui %0 : i1 to i32
    %c0_i32_0 = arith.constant 0 : i32
    %2 = arith.cmpi ne, %1, %c0_i32_0 : i32
    scf.if %2 {
      %cst_33 = arith.constant 0.000000e+00 : f32
      %76 = vector.broadcast %cst_33 : f32 to vector<3x256xf32>
      %c0_34 = arith.constant 0 : index
      %c0_35 = arith.constant 0 : index
      %77 = vector.load %arg11[%c0_34, %c0_35] : memref<3x256xf32, #tpu.memory_space<vmem>>, vector<3x256xf32>
      tpu.vector_store %arg11[%c0_34, %c0_35], %76 {strides = array<i32>} : memref<3x256xf32, #tpu.memory_space<vmem>>, vector<3x256xf32>,
    } else {
    }
    %c0 = arith.constant 0 : index
    %c0_1 = arith.constant 0 : index
    %3 = vector.load %arg2[%c0, %c0_1] : memref<2x256xf32, #tpu.memory_space<vmem>>, vector<2x256xf32>
    %c0_2 = arith.constant 0 : index
    %c0_3 = arith.constant 0 : index
    %4 = vector.load %arg4[%c0_2, %c0_3] : memref<32x2xf32, #tpu.memory_space<vmem>>, vector<32x2xf32>
    %5 = vector.extract_strided_slice %4 {offsets = [0, 0], sizes = [32, 1], strides = [1, 1]} : vector<32x2xf32> to vector<32x1xf32>
    %6 = vector.extract_strided_slice %3 {offsets = [0, 0], sizes = [1, 256], strides = [1, 1]} : vector<2x256xf32> to vector<1x256xf32>
    %7 = vector.broadcast %5 : vector<32x1xf32> to vector<32x256xf32>
    %8 = vector.broadcast %6 : vector<1x256xf32> to vector<32x256xf32>
    %9 = arith.mulf %7, %8 : vector<32x256xf32>
    %10 = vector.extract_strided_slice %4 {offsets = [0, 1], sizes = [32, 1], strides = [1, 1]} : vector<32x2xf32> to vector<32x1xf32>
    %11 = vector.extract_strided_slice %3 {offsets = [1, 0], sizes = [1, 256], strides = [1, 1]} : vector<2x256xf32> to vector<1x256xf32>
    %12 = vector.broadcast %10 : vector<32x1xf32> to vector<32x256xf32>
    %13 = vector.broadcast %11 : vector<1x256xf32> to vector<32x256xf32>
    %14 = arith.mulf %12, %13 : vector<32x256xf32>
    %15 = arith.addf %9, %14 : vector<32x256xf32>
    %c0_4 = arith.constant 0 : index
    %c0_5 = arith.constant 0 : index
    %16 = vector.load %arg5[%c0_4, %c0_5] : memref<32x1xf32, #tpu.memory_space<vmem>>, vector<32x1xf32>
    %17 = vector.broadcast %16 : vector<32x1xf32> to vector<32x256xf32>
    %18 = arith.addf %15, %17 : vector<32x256xf32>
    %cst = arith.constant 5.000000e-01 : f32
    %19 = vector.broadcast %cst : f32 to vector<32x256xf32>
    %20 = arith.mulf %19, %18 : vector<32x256xf32>
    %cst_6 = arith.constant 4.471500e-02 : f32
    %21 = vector.broadcast %cst_6 : f32 to vector<32x256xf32>
    %22 = arith.mulf %21, %18 : vector<32x256xf32>
    %23 = arith.mulf %22, %18 : vector<32x256xf32>
    %24 = arith.mulf %23, %18 : vector<32x256xf32>
    %25 = arith.addf %18, %24 : vector<32x256xf32>
    %cst_7 = arith.constant 0.797884583 : f32
    %26 = vector.broadcast %cst_7 : f32 to vector<32x256xf32>
    %27 = arith.mulf %26, %25 : vector<32x256xf32>
    %28 = math.tanh %27 : vector<32x256xf32>
    %cst_8 = arith.constant 1.000000e+00 : f32
    %29 = vector.broadcast %cst_8 : f32 to vector<32x256xf32>
    %30 = arith.addf %29, %28 : vector<32x256xf32>
    %31 = arith.mulf %20, %30 : vector<32x256xf32>
    %c0_9 = arith.constant 0 : index
    %c0_10 = arith.constant 0 : index
    %32 = vector.load %arg6[%c0_9, %c0_10] : memref<32x32xf32, #tpu.memory_space<vmem>>, vector<32x32xf32>
    %cst_11 = arith.constant dense<0.000000e+00> : vector<32x256xf32>
    %33 = tpu.matmul %32, %31, %cst_11 {dimension_numbers = #tpu.dot_dimension_numbers<[1], [0], [0], [1], [0, 0, 1, 1], [], []>} : vector<32x32xf32>, vector<32x256xf32>, vector<32x256xf32> -> vector<32x256xf32>
    %c0_12 = arith.constant 0 : index
    %c0_13 = arith.constant 0 : index
    %34 = vector.load %arg7[%c0_12, %c0_13] : memref<32x1xf32, #tpu.memory_space<vmem>>, vector<32x1xf32>
    %35 = vector.broadcast %34 : vector<32x1xf32> to vector<32x256xf32>
    %36 = arith.addf %33, %35 : vector<32x256xf32>
    %cst_14 = arith.constant 5.000000e-01 : f32
    %37 = vector.broadcast %cst_14 : f32 to vector<32x256xf32>
    %38 = arith.mulf %37, %36 : vector<32x256xf32>
    %cst_15 = arith.constant 4.471500e-02 : f32
    %39 = vector.broadcast %cst_15 : f32 to vector<32x256xf32>
    %40 = arith.mulf %39, %36 : vector<32x256xf32>
    %41 = arith.mulf %40, %36 : vector<32x256xf32>
    %42 = arith.mulf %41, %36 : vector<32x256xf32>
    %43 = arith.addf %36, %42 : vector<32x256xf32>
    %cst_16 = arith.constant 0.797884583 : f32
    %44 = vector.broadcast %cst_16 : f32 to vector<32x256xf32>
    %45 = arith.mulf %44, %43 : vector<32x256xf32>
    %46 = math.tanh %45 : vector<32x256xf32>
    %cst_17 = arith.constant 1.000000e+00 : f32
    %47 = vector.broadcast %cst_17 : f32 to vector<32x256xf32>
    %48 = arith.addf %47, %46 : vector<32x256xf32>
    %49 = arith.mulf %38, %48 : vector<32x256xf32>
    %c0_18 = arith.constant 0 : index
    %c0_19 = arith.constant 0 : index
    %50 = vector.load %arg8[%c0_18, %c0_19] : memref<3x32xf32, #tpu.memory_space<vmem>>, vector<3x32xf32>
    %cst_20 = arith.constant dense<0.000000e+00> : vector<3x256xf32>
    %51 = tpu.matmul %50, %49, %cst_20 {dimension_numbers = #tpu.dot_dimension_numbers<[1], [0], [0], [1], [0, 0, 1, 1], [], []>} : vector<3x32xf32>, vector<32x256xf32>, vector<3x256xf32> -> vector<3x256xf32>
    %c0_21 = arith.constant 0 : index
    %c0_22 = arith.constant 0 : index
    %52 = vector.load %arg9[%c0_21, %c0_22] : memref<3x1xf32, #tpu.memory_space<vmem>>, vector<3x1xf32>
    %53 = vector.broadcast %52 : vector<3x1xf32> to vector<3x256xf32>
    %54 = arith.addf %51, %53 : vector<3x256xf32>
    %c0_23 = arith.constant 0 : index
    %c0_24 = arith.constant 0 : index
    %55 = vector.load %arg3[%c0_23, %c0_24] : memref<3x256xf32, #tpu.memory_space<vmem>>, vector<3x256xf32>
    %56 = arith.subf %55, %54 : vector<3x256xf32>
    %c1_i32 = arith.constant 1 : i32
    %57 = arith.muli %arg0, %c1_i32 : i32
    %58 = arith.addi %57, %arg1 : i32
    %c256_i32 = arith.constant 256 : i32
    %59 = arith.muli %58, %c256_i32 : i32
    %60 = tpu.iota {dimensions = array<i32: 1>} : vector<1x256xi32>
    %61 = vector.broadcast %59 : i32 to vector<1x256xi32>
    %62 = arith.addi %61, %60 : vector<1x256xi32>
    %c0_25 = arith.constant 0 : index
    %c0_26 = arith.constant 0 : index
    %63 = vector.load %arg11[%c0_25, %c0_26] : memref<3x256xf32, #tpu.memory_space<vmem>>, vector<3x256xf32>
    %c256_i32_27 = arith.constant 256 : i32
    %64 = vector.broadcast %c256_i32_27 : i32 to vector<1x256xi32>
    %65 = arith.cmpi slt, %62, %64 : vector<1x256xi32>
    %66 = arith.mulf %56, %56 : vector<3x256xf32>
    %cst_28 = arith.constant 0.000000e+00 : f32
    %67 = vector.shape_cast %65 : vector<1x256xi1> to vector<1x256xi1>
    %68 = vector.broadcast %67 : vector<1x256xi1> to vector<3x256xi1>
    %69 = vector.broadcast %cst_28 : f32 to vector<3x256xf32>
    %70 = arith.select %68, %66, %69 : vector<3x256xi1>, vector<3x256xf32>
    %71 = arith.addf %63, %70 : vector<3x256xf32>
    %c0_29 = arith.constant 0 : index
    %c0_30 = arith.constant 0 : index
    %72 = vector.load %arg11[%c0_29, %c0_30] : memref<3x256xf32, #tpu.memory_space<vmem>>, vector<3x256xf32>
    tpu.vector_store %arg11[%c0_29, %c0_30], %71 {strides = array<i32>} : memref<3x256xf32, #tpu.memory_space<vmem>>, vector<3x256xf32>,
    %c0_i32_31 = arith.constant 0 : i32
    %73 = arith.cmpi eq, %arg1, %c0_i32_31 : i32
    %74 = arith.extui %73 : i1 to i32
    %c0_i32_32 = arith.constant 0 : i32
    %75 = arith.cmpi ne, %74, %c0_i32_32 : i32
    scf.if %75 {
      %c0_33 = arith.constant 0 : index
      %c0_34 = arith.constant 0 : index
      %76 = vector.load %arg11[%c0_33, %c0_34] : memref<3x256xf32, #tpu.memory_space<vmem>>, vector<3x256xf32>
      %77 = vector.shape_cast %76 : vector<3x256xf32> to vector<1x3x256xf32>
      %cst_35 = arith.constant dense<0.000000e+00> : vector<1xf32>
      %78 = vector.multi_reduction <add>, %77, %cst_35 [1, 2] : vector<1x3x256xf32> to vector<1xf32>
      %79 = vector.shape_cast %78 : vector<1xf32> to vector<1x1x1xf32>
      %80 = vector.extract %79[0, 0, 0] : f32 from vector<1x1x1xf32>
      %81 = vector.broadcast %80 : f32 to vector<1x1x1xf32>
      %c0_36 = arith.constant 0 : index
      %c0_37 = arith.constant 0 : index
      %c0_38 = arith.constant 0 : index
      %82 = vector.load %arg10[%c0_36, %c0_37, %c0_38] : memref<1x1x1xf32, #tpu.memory_space<vmem>>, vector<1x1x1xf32>
      tpu.vector_store %arg10[%c0_36, %c0_37, %c0_38], %81 {strides = array<i32>} : memref<1x1x1xf32, #tpu.memory_space<vmem>>, vector<1x1x1xf32>,
    } else {
    }
    return
  }
  func.func @transform_0(%arg0: i32, %arg1: i32) -> (i32, i32) {
    %c1_i32 = arith.constant 1 : i32
    %0 = arith.muli %arg0, %c1_i32 : i32
    %1 = arith.addi %0, %arg1 : i32
    %c0_i32 = arith.constant 0 : i32
    %c0_i32_0 = arith.constant 0 : i32
    return %c0_i32, %1 : i32, i32
  }
  func.func @transform_1(%arg0: i32, %arg1: i32) -> (i32, i32) {
    %c1_i32 = arith.constant 1 : i32
    %0 = arith.muli %arg0, %c1_i32 : i32
    %1 = arith.addi %0, %arg1 : i32
    %c0_i32 = arith.constant 0 : i32
    %c0_i32_0 = arith.constant 0 : i32
    return %c0_i32, %1 : i32, i32
  }
  func.func @transform_2(%arg0: i32, %arg1: i32) -> (i32, i32) {
    %c0_i32 = arith.constant 0 : i32
    %c0_i32_0 = arith.constant 0 : i32
    %c0_i32_1 = arith.constant 0 : i32
    return %c0_i32, %c0_i32_0 : i32, i32
  }
  func.func @transform_3(%arg0: i32, %arg1: i32) -> (i32, i32) {
    %c0_i32 = arith.constant 0 : i32
    %c0_i32_0 = arith.constant 0 : i32
    %c0_i32_1 = arith.constant 0 : i32
    return %c0_i32, %c0_i32_0 : i32, i32
  }
  func.func @transform_4(%arg0: i32, %arg1: i32) -> (i32, i32) {
    %c0_i32 = arith.constant 0 : i32
    %c0_i32_0 = arith.constant 0 : i32
    %c0_i32_1 = arith.constant 0 : i32
    return %c0_i32, %c0_i32_0 : i32, i32
  }
  func.func @transform_5(%arg0: i32, %arg1: i32) -> (i32, i32) {
    %c0_i32 = arith.constant 0 : i32
    %c0_i32_0 = arith.constant 0 : i32
    %c0_i32_1 = arith.constant 0 : i32
    return %c0_i32, %c0_i32_0 : i32, i32
  }
  func.func @transform_6(%arg0: i32, %arg1: i32) -> (i32, i32) {
    %c0_i32 = arith.constant 0 : i32
    %c0_i32_0 = arith.constant 0 : i32
    %c0_i32_1 = arith.constant 0 : i32
    return %c0_i32, %c0_i32_0 : i32, i32
  }
  func.func @transform_7(%arg0: i32, %arg1: i32) -> (i32, i32) {
    %c0_i32 = arith.constant 0 : i32
    %c0_i32_0 = arith.constant 0 : i32
    %c0_i32_1 = arith.constant 0 : i32
    return %c0_i32, %c0_i32_0 : i32, i32
  }
  func.func @transform_8(%arg0: i32, %arg1: i32) -> (i32, i32, i32) {
    %c0_i32 = arith.constant 0 : i32
    %c0_i32_0 = arith.constant 0 : i32
    %c0_i32_1 = arith.constant 0 : i32
    return %arg0, %c0_i32, %c0_i32_0 : i32, i32, i32
  }
}

</mosaic_0001>

<bundles_post_ra>
// kernel: tpu_custom_call.1
= control target key start
LH: loop header
LB: loop body
LE: loop exit
PB: predicated region body
PF: predicated region fallthrough
CT: control target
= control target key end

     0   :  { %s1142_s27 = smov 0   ;;  %s1144_s28 = smov 0   ;;  %s1339_s0 = inlined_call_operand.vmem [shape: f32[2,512], index: 0, kind: input, shape index: {}]   ;;  %s1340_s1 = inlined_call_operand.vmem [shape: f32[3,512], index: 1, kind: input, shape index: {}]   ;;  %s1341_s2 = inlined_call_operand.vmem [shape: f32[32,2], index: 2, kind: input, shape index: {}]   ;;  %s1342_s3 = inlined_call_operand.vmem [shape: f32[32,1], index: 3, kind: input, shape index: {}]   ;;  %s1343_s4 = inlined_call_operand.vmem [shape: f32[32,32], index: 4, kind: input, shape index: {}]   ;;  %s1344_s5 = inlined_call_operand.vmem [shape: f32[32,1], index: 5, kind: input, shape index: {}]   ;;  %s1345_s6 = inlined_call_operand.vmem [shape: f32[3,32], index: 6, kind: input, shape index: {}]   ;;  %s1346_s7 = inlined_call_operand.vmem [shape: f32[3,1], index: 7, kind: input, shape index: {}]   ;;  %s1347_s8 = inlined_call_operand.vmem [shape: f32[2,1,1], index: 8, kind: output, shape index: {}]  }
   0x1   :  { %s1146_s29 = smov 0  }
   0x2 LB: > { %s30_s30 = sadd.s32 1, %s1088_s28  ;;  %p973_p0 = scmp.ge.s32.totalorder %s1092_s29, 1  ;;  %s1092_s29 = sphi %s1146_s29, %s18_s29   ;;  %s1088_s28 = sphi %s1144_s28, %s1349_s28   ;;  %s1084_s27 = sphi %s1142_s27, %s1348_s27  }
   0x3   : > { %p32_p1 = scmp.ge.s32.totalorder %s30_s30, 2  ;;  %p294_p2 = scmp.lt.s32.totalorder %s1092_s29, 3 }
   0x5   : > { %s1351_s30 = smov (%p32_p1, %s30_s30), 0  ;;  %p295_p3 = pnand %p973_p0, %p294_p2 }
   0x6   : > { %v360_v0 = vld [vmem:[%s1341_s2 + $0x10] sm:$0xff] (!%p295_p3)  ;;  %v358_v1 = vld [vmem:[%s1341_s2] sm:$0xff] (!%p295_p3)  ;;  %v1094_v2 = vmov (!%p295_p3), 1   ;;  %v359_v3 = vld [vmem:[%s1341_s2 + $0x8] sm:$0xff] (!%p295_p3)  ;;  %v1095_v4 = vmov (!%p295_p3), 0   ;;  %v1096_v15 = vmov (!%p295_p3), 0.0   ;;  %v383_v16 = vlaneseq (!%p295_p3) }
   0x7   : > { %298 = sbr.rel (%p295_p3) target bundleno = 901 (0x385), region = 52  ;;  %1033 = vset.pattern.permute.xlu0 (!%p295_p3), %v1094_v2  ;;  %1031 = vset.pattern.permute.xlu1 (!%p295_p3), %v1094_v2  ;;  %v361_v5 = vld [vmem:[%s1341_s2 + $0x18] sm:$0xff] (!%p295_p3)  ;;  %v460_v6 = vld [vmem:[%s1342_s3 + $0x8] sm:$0xff] (!%p295_p3)  ;;  %v459_v7 = vld [vmem:[%s1342_s3] sm:$0xff] (!%p295_p3)  ;;  %356 = vst [vmem:[#allocation2] sm:$0x77] (!%p295_p3), %v1096_v15 }
   0x8   : > { %418 = vperm.xlu0 (!%p295_p3), %1033, %v360_v0   ;;  %410 = vperm.xlu1 (!%p295_p3), %1031, %v358_v1   ;;  %v567_v8 = vld [vmem:[%s1344_s5] sm:$0xff] (!%p295_p3)  ;;  %v461_v9 = vld [vmem:[%s1342_s3 + $0x10] sm:$0xff] (!%p295_p3)  ;;  %v462_v11 = vld [vmem:[%s1342_s3 + $0x18] sm:$0xff] (!%p295_p3)  ;;  %s974_s17 = sshll.u32 (!%p295_p3), %s1084_s27, 1  ;;  %v384_v17 = vshrl.u32 (!%p295_p3), %v383_v16, 7  ;;  %vm591_vm0 = vcmask (!%p295_p3), 261120  }
   0x9   : > { %v569_v10 = vld [vmem:[%s1344_s5 + $0x10] sm:$0xff] (!%p295_p3)  ;;  %v766_v12 = vld [vmem:[%s1346_s7] sm:$0x7] (!%p295_p3)  ;;  %v568_v13 = vld [vmem:[%s1344_s5 + $0x8] sm:$0xff] (!%p295_p3)  ;;  %668 = vmatprep.mubr.f32.mxu0 (!%p295_p3), %v1096_v15  ;;  %839 = vmatprep.mubr.f32.mxu1 (!%p295_p3), %v1096_v15  ;;  %p335_p4 = scmp.lt.s32.totalorder (!%p295_p3), %s974_s17, 3  ;;  %s983_s15 = sshll.u32 (!%p295_p3), %s1084_s27, 8 }
   0xa   : > { %v570_v14 = vld [vmem:[%s1344_s5 + $0x18] sm:$0xff] (!%p295_p3)  ;;  %v385_v20 = vsub.s32 (!%p295_p3), 0, %v384_v17  ;;  %v389_v21 = vsub.s32 (!%p295_p3), 2, %v384_v17  ;;  %v427_v22 = vsub.s32 (!%p295_p3), 1, %v384_v17  ;;  %v431_v23 = vsub.s32 (!%p295_p3), 3, %v384_v17  ;;  %p349_p5 = scmp.lt.s32.totalorder (!%p295_p3), %s1084_s27, 1 }
   0xb   : > { %vm886_vm3 = vcmask (!%p295_p3), 1042432   ;;  %vm900_vm4 = vcmask (!%p295_p3), 0  }
   0xc   : > { %1034 = vset.pattern.permute.xlu0 (!%p295_p3), %v1095_v4  ;;  %414 = vperm.xlu1 (!%p295_p3), %1031, %v359_v3  }
   0xd   : > { %364 = vperm.xlu0 (!%p295_p3), %1034, %v358_v1  }
   0xe   : > { %s1353_s17 = smov (!%p335_p4, %s974_s17), 3  ;;  %s1355_s27 = smov (!%p349_p5, %s1084_s27), 1 }
   0xf   : > { %s975_s18 = sshll.u32 %s1353_s17, 1  ;;  %s977_s14 = sshll.u32 %s1353_s17, 2 }
  0x10   : > { %1032 = vset.pattern.permute.xlu1 %v1095_v4  ;;  %s338_s21 = scalar_lea.vmem %s1339_s0, %s975_s18  ;;  %s346_s19 = scalar_lea.vmem %s1340_s1, %s977_s14 }
  0x11   : > { %369 = vperm.xlu0 %1034, %v359_v3   ;;  %379 = vperm.xlu1 %1032, %v361_v5   ;;  %v357_v24 = vld [vmem:[%s338_s21] sm:$0xf]  ;;  %s351_s21 = scalar_lea.vmem %s1347_s8, %s1355_s27 }
  0x12   : > { %v386_v27 = vrot.slane %v357_v24, %v385_v20  ;;  %v390_v28 = vrot.slane %v357_v24, %v389_v21  ;;  %v428_v29 = vrot.slane %v357_v24, %v427_v22  ;;  %v432_v30 = vrot.slane %v357_v24, %v431_v23 }
  0x14   : > { %v396_v31 = vrot.slane %v386_v27, %v385_v20  ;;  %v400_v32 = vrot.slane %v390_v28, %v385_v20  ;;  %v438_v35 = vrot.slane %v428_v29, %v427_v22  ;;  %v442_v36 = vrot.slane %v432_v30, %v427_v22 }
  0x15   : > { %374 = vperm.xlu0 %1034, %v360_v0   ;;  %1035 = vset.pattern.permute.xlu1 %v1094_v2 }
  0x16   : > { %422 = vperm.xlu1 %1035, %v361_v5  }
  0x19   : > { %470 = vperm.xlu0 %1034, %v460_v6  }
  0x1a   : > { %1036 = vset.pattern.permute.xlu1 %v1095_v4 }
  0x1b   : > { %465 = vperm.xlu1 %1036, %v459_v7  }
  0x1d   : > { %573 = vperm.xlu0 %1034, %v567_v8  }
  0x1f   : > { %475 = vperm.xlu1 %1036, %v461_v9  }
  0x21   : > { %583 = vperm.xlu0 %1034, %v569_v10  }
  0x23   : > { %480 = vperm.xlu1 %1036, %v462_v11  }
  0x25   : > { %769 = vperm.xlu0 %1034, %v766_v12  }
  0x27   : > { %578 = vperm.xlu1 %1036, %v568_v13  }
  0x2b   : > { %588 = vperm.xlu1 %1036, %v570_v14  }
  0x87   : > { %v411_v18 = vpop.permute.xlu1 %410  ;;  %v419_v19 = vpop.permute.xlu0 %418 }
  0x88   : > { %v443_v45 = vmul.f32 %v438_v35, %v411_v18  ;;  %v444_v46 = vmul.f32 %v442_v36, %v411_v18  ;;  %v447_v56 = vmul.f32 %v438_v35, %v419_v19  ;;  %v448_v58 = vmul.f32 %v442_v36, %v419_v19 }
  0x8b   : > { %v415_v25 = vpop.permute.xlu1 %414 }
  0x8c   : > { %v365_v26 = vpop.permute.xlu0 %364  ;;  %v445_v42 = vmul.f32 %v438_v35, %v415_v25  ;;  %v446_v43 = vmul.f32 %v442_v36, %v415_v25 }
  0x8d   : > { %v401_v39 = vmul.f32 %v396_v31, %v365_v26  ;;  %v402_v40 = vmul.f32 %v400_v32, %v365_v26 }
  0x8f   : > { %v451_v50 = vadd.f32 %v443_v45, %v401_v39  ;;  %v452_v51 = vadd.f32 %v444_v46, %v402_v40 }
  0x90   : > { %v370_v33 = vpop.permute.xlu0 %369  ;;  %v380_v34 = vpop.permute.xlu1 %379 }
  0x91   : > { %v403_v37 = vmul.f32 %v396_v31, %v370_v33  ;;  %v404_v38 = vmul.f32 %v400_v32, %v370_v33  ;;  %v407_v5 = vmul.f32 %v396_v31, %v380_v34  ;;  %v408_v6 = vmul.f32 %v400_v32, %v380_v34 }
  0x93   : > { %v453_v47 = vadd.f32 %v445_v42, %v403_v37  ;;  %v454_v48 = vadd.f32 %v446_v43, %v404_v38 }
  0x94   : > { %v375_v41 = vpop.permute.xlu0 %374 }
  0x95   : > { %v423_v44 = vpop.permute.xlu1 %422  ;;  %v405_v52 = vmul.f32 %v396_v31, %v375_v41  ;;  %v406_v53 = vmul.f32 %v400_v32, %v375_v41 }
  0x96   : > { %v449_v62 = vmul.f32 %v438_v35, %v423_v44  ;;  %v450_v63 = vmul.f32 %v442_v36, %v423_v44 }
  0x97   : > { %v455_v2 = vadd.f32 %v447_v56, %v405_v52  ;;  %v456_v3 = vadd.f32 %v448_v58, %v406_v53 }
  0x98   : > { %v471_v49 = vpop.permute.xlu0 %470  ;;  %v457_v14 = vadd.f32 %v449_v62, %v407_v5  ;;  %v458_v17 = vadd.f32 %v450_v63, %v408_v6 }
  0x99   : > { %v1212_v54 = vadd.f32 %v471_v49, %v453_v47  ;;  %v1214_v55 = vadd.f32 %v471_v49, %v454_v48 }
  0x9a   : > { %v466_v57 = vpop.permute.xlu1 %465 }
  0x9b   : > { %v501_v59 = vmul.f32 0.044715, %v1212_v54  ;;  %v1217_v60 = vadd.f32 %v466_v57, %v451_v50  ;;  %v1219_v61 = vadd.f32 %v466_v57, %v452_v51  ;;  %v502_v0 = vmul.f32 0.044715, %v1214_v55 }
  0x9d   : > { %v499_v1 = vmul.f32 0.044715, %v1217_v60  ;;  %v500_v4 = vmul.f32 0.044715, %v1219_v61  ;;  %v510_v8 = vmul.f32 %v502_v0, %v1214_v55  ;;  %v509_v9 = vmul.f32 %v501_v59, %v1212_v54 }
  0x9e   : > { %v476_v7 = vpop.permute.xlu1 %475  ;;  %v492_v63 = vmul.f32 0.5, %v1219_v61  ;;  %v494_v0 = vmul.f32 0.5, %v1214_v55 }
  0x9f   : > { %v1226_v10 = vadd.f32 %v476_v7, %v455_v2  ;;  %v1228_v11 = vadd.f32 %v476_v7, %v456_v3  ;;  %v508_v12 = vmul.f32 %v500_v4, %v1219_v61  ;;  %v507_v13 = vmul.f32 %v499_v1, %v1217_v60 }
  0xa0   : > { %v518_v18 = vmul.f32 %v510_v8, %v1214_v55  ;;  %v517_v19 = vmul.f32 %v509_v9, %v1212_v54  ;;  %v491_v2 = vmul.f32 0.5, %v1217_v60  ;;  %v493_v3 = vmul.f32 0.5, %v1212_v54 }
  0xa1   : > { %v503_v20 = vmul.f32 0.044715, %v1226_v10  ;;  %v504_v21 = vmul.f32 0.044715, %v1228_v11  ;;  %v516_v22 = vmul.f32 %v508_v12, %v1219_v61  ;;  %v515_v23 = vmul.f32 %v507_v13, %v1217_v60 }
  0xa2   : > { %v481_v24 = vpop.permute.xlu1 %480  ;;  %v526_v25 = vadd.f32 %v518_v18, %v1214_v55  ;;  %v525_v26 = vadd.f32 %v517_v19, %v1212_v54  ;;  %v496_v55 = vmul.f32 0.5, %v1228_v11  ;;  %v495_v54 = vmul.f32 0.5, %v1226_v10 }
  0xa3   : > { %v511_v27 = vmul.f32 %v503_v20, %v1226_v10  ;;  %v512_v28 = vmul.f32 %v504_v21, %v1228_v11  ;;  %v489_v29 = vadd.f32 %v481_v24, %v457_v14  ;;  %v490_v30 = vadd.f32 %v481_v24, %v458_v17 }
  0xa4   : > { %v524_v31 = vadd.f32 %v516_v22, %v1219_v61  ;;  %v534_v32 = vmul.f32 0.7978846, %v526_v25  ;;  %v523_v33 = vadd.f32 %v515_v23, %v1217_v60  ;;  %v533_v34 = vmul.f32 0.7978846, %v525_v26 }
  0xa5   : > { %v505_v35 = vmul.f32 0.044715, %v489_v29  ;;  %v506_v36 = vmul.f32 0.044715, %v490_v30  ;;  %v520_v37 = vmul.f32 %v512_v28, %v1228_v11  ;;  %v519_v43 = vmul.f32 %v511_v27, %v1226_v10 }
  0xa6   : > { %v532_v38 = vmul.f32 0.7978846, %v524_v31  ;;  %1038 = vtanh.f32 %v534_v32  ;;  %v531_v39 = vmul.f32 0.7978846, %v523_v33  ;;  %v498_v60 = vmul.f32 0.5, %v490_v30  ;;  %v563_v31 = vld [vmem:[%s1343_s4] sm:$0xff] }
  0xa7   : > { %v513_v40 = vmul.f32 %v505_v35, %v489_v29  ;;  %v514_v41 = vmul.f32 %v506_v36, %v490_v30  ;;  %1040 = vtanh.f32 %v533_v34  ;;  %v528_v42 = vadd.f32 %v520_v37, %v1228_v11  ;;  %v565_v11 = vld [vmem:[%s1343_s4 + $0x10] sm:$0xff]  ;;  %v579_v37 = vpop.permute.xlu1 %578 }
  0xa8   : > { %1042 = vtanh.f32 %v532_v38  ;;  %v527_v47 = vadd.f32 %v519_v43, %v1226_v10  ;;  %v497_v21 = vmul.f32 0.5, %v489_v29  ;;  %v564_v10 = vld [vmem:[%s1343_s4 + $0x8] sm:$0xff] }
  0xa9   : > { %1044 = vtanh.f32 %v531_v39  ;;  %v522_v44 = vmul.f32 %v514_v41, %v490_v30  ;;  %v536_v45 = vmul.f32 0.7978846, %v528_v42  ;;  %v521_v46 = vmul.f32 %v513_v40, %v489_v29 }
  0xaa   : > { %v535_v50 = vmul.f32 0.7978846, %v527_v47 }
  0xab   : > { %v530_v48 = vadd.f32 %v522_v44, %v490_v30  ;;  %1046 = vtanh.f32 %v536_v45  ;;  %v529_v49 = vadd.f32 %v521_v46, %v489_v29  ;;  %v566_v29 = vld [vmem:[%s1343_s4 + $0x18] sm:$0xff]  ;;  %v574_v30 = vpop.permute.xlu0 %573 }
  0xac   : > { %1048 = vtanh.f32 %v535_v50 }
  0xad   : > { %v538_v51 = vmul.f32 0.7978846, %v530_v48  ;;  %v537_v52 = vmul.f32 0.7978846, %v529_v49 }
  0xaf   : > { %1050 = vtanh.f32 %v538_v51  ;;  %v584_v46 = vpop.permute.xlu0 %583 }
  0xb0   : > { %v1039_v53 = vpop.eup %1038  ;;  %1052 = vtanh.f32 %v537_v52 }
  0xb1   : > { %v1041_v56 = vpop.eup %1040  ;;  %v550_v57 = vadd.f32 1.0, %v1039_v53 }
  0xb2   : > { %v1043_v58 = vpop.eup %1042  ;;  %v549_v59 = vadd.f32 1.0, %v1041_v56 }
  0xb3   : > { %v1045_v62 = vpop.eup %1044  ;;  %v548_v1 = vadd.f32 1.0, %v1043_v58  ;;  %v558_v7 = vmul.f32 %v550_v57, %v494_v0  ;;  %v589_v0 = vpop.permute.xlu1 %588 }
  0xb4   : > { %v547_v4 = vadd.f32 1.0, %v1045_v62  ;;  %v557_v9 = vmul.f32 %v549_v59, %v493_v3 }
  0xb5   : > { %v1047_v5 = vpop.eup %1046  ;;  %v556_v6 = vmul.f32 %v548_v1, %v492_v63 }
  0xb6   : > { %v555_v8 = vmul.f32 %v547_v4, %v491_v2  ;;  %v1049_v13 = vpop.eup %1048  ;;  %v552_v17 = vadd.f32 1.0, %v1047_v5 }
  0xb7   : > { %v986_v12 = vpack.c.bf16 %v558_v7, %v556_v6  ;;  %v551_v61 = vadd.f32 1.0, %v1049_v13 }
  0xb8   : > { %v988_v14 = vpack.c.bf16 %v557_v9, %v555_v8  ;;  %v560_v23 = vmul.f32 %v552_v17, %v496_v55 }
  0xb9   : > { %v1051_v18 = vpop.eup %1050  ;;  %987 = vmatprep.subr.bf16.mxu0 %v986_v12  ;;  %v559_v25 = vmul.f32 %v551_v61, %v495_v54 }
  0xba   : > { %v1053_v19 = vpop.eup %1052  ;;  %989 = vmatpush1.bf16.msra.mxu0 %v988_v14  ;;  %v554_v20 = vadd.f32 1.0, %v1051_v18 }
  0xbb   : > { %v553_v22 = vadd.f32 1.0, %v1053_v19 }
  0xbc   : > { %v562_v24 = vmul.f32 %v554_v20, %v498_v60 }
  0xbd   : > { %v561_v26 = vmul.f32 %v553_v22, %v497_v21 }
  0xbe   : > { %v990_v27 = vpack.c.bf16 %v562_v24, %v560_v23 }
  0xbf   : > { %v992_v28 = vpack.c.bf16 %v561_v26, %v559_v25 }
  0xc0   : > { %991 = vmatprep.subr.bf16.mxu0 %v990_v27 }
  0xc1   : > { %993 = vmatpush1.bf16.msra.mxu0 %v992_v28 }
  0xc4   : > { %978 = vmatmul.mubr.msk.f32.vlgmr.msra.gmra.mrb[0].mxu0 %vm591_vm0, %v563_v31 }
  0xc5   : > { %674 = vmatprep.mubr.f32.mxu0 %v1096_v15 }
  0xc8   : > { %979 = vmatmul.mubr.msk.f32.gmra.mrb[2].mxu0 %vm591_vm0, %v564_v10 }
  0xc9   : > { %680 = vmatprep.mubr.f32.mxu0 %v1096_v15 }
  0xcc   : > { %980 = vmatmul.mubr.msk.f32.gmra.mrb[4].mxu0 %vm591_vm0, %v565_v11 }
  0xcd   : > { %686 = vmatprep.mubr.f32.mxu0 %v1096_v15 }
  0xd0   : > { %981 = vmatmul.mubr.msk.f32.gmra.mrb[6].mxu0 %vm591_vm0, %v566_v29 }
 0x197   : > { %v670_v32 = vpop.f32.mrb[0].mxu0 }
 0x198   : > { %v1273_v33 = vadd.f32 %v670_v32, %v574_v30  ;;  %v672_v34 = vpop.f32.mrb[1].mxu0 }
 0x199   : > { %v1275_v35 = vadd.f32 %v672_v34, %v574_v30 }
 0x19a   : > { %v701_v36 = vmul.f32 0.044715, %v1273_v33 }
 0x19b   : > { %v702_v38 = vmul.f32 0.044715, %v1275_v35  ;;  %v676_v39 = vpop.f32.mrb[2].mxu0 }
 0x19c   : > { %v709_v15 = vmul.f32 %v701_v36, %v1273_v33  ;;  %v1280_v40 = vadd.f32 %v676_v39, %v579_v37  ;;  %v678_v41 = vpop.f32.mrb[3].mxu0  ;;  %v693_v36 = vmul.f32 0.5, %v1273_v33  ;;  %v694_v39 = vmul.f32 0.5, %v1275_v35 }
 0x19d   : > { %v1282_v42 = vadd.f32 %v678_v41, %v579_v37  ;;  %v710_v43 = vmul.f32 %v702_v38, %v1275_v35 }
 0x19e   : > { %v703_v44 = vmul.f32 0.044715, %v1280_v40  ;;  %v717_v45 = vmul.f32 %v709_v15, %v1273_v33  ;;  %v695_v37 = vmul.f32 0.5, %v1280_v40 }
 0x19f   : > { %v704_v47 = vmul.f32 0.044715, %v1282_v42  ;;  %v682_v48 = vpop.f32.mrb[4].mxu0  ;;  %v718_v49 = vmul.f32 %v710_v43, %v1275_v35  ;;  %v696_v15 = vmul.f32 0.5, %v1282_v42 }
 0x1a0   : > { %v711_v50 = vmul.f32 %v703_v44, %v1280_v40  ;;  %v1290_v51 = vadd.f32 %v682_v48, %v584_v46  ;;  %v684_v52 = vpop.f32.mrb[5].mxu0  ;;  %v725_v53 = vadd.f32 %v717_v45, %v1273_v33 }
 0x1a1   : > { %v1293_v56 = vadd.f32 %v684_v52, %v584_v46  ;;  %v712_v57 = vmul.f32 %v704_v47, %v1282_v42  ;;  %v726_v58 = vadd.f32 %v718_v49, %v1275_v35 }
 0x1a2   : > { %v705_v59 = vmul.f32 0.044715, %v1290_v51  ;;  %v719_v62 = vmul.f32 %v711_v50, %v1280_v40  ;;  %v733_v63 = vmul.f32 0.7978846, %v725_v53 }
 0x1a3   : > { %v706_v1 = vmul.f32 0.044715, %v1293_v56  ;;  %v688_v2 = vpop.f32.mrb[6].mxu0  ;;  %v720_v3 = vmul.f32 %v712_v57, %v1282_v42  ;;  %v734_v4 = vmul.f32 0.7978846, %v726_v58  ;;  %v698_v58 = vmul.f32 0.5, %v1293_v56 }
 0x1a4   : > { %v713_v5 = vmul.f32 %v705_v59, %v1290_v51  ;;  %v689_v6 = vadd.f32 %v688_v2, %v589_v0  ;;  %v690_v7 = vpop.f32.mrb[7].mxu0  ;;  %v727_v8 = vadd.f32 %v719_v62, %v1280_v40  ;;  %1054 = vtanh.f32 %v733_v63 }
 0x1a5   : > { %v714_v9 = vmul.f32 %v706_v1, %v1293_v56  ;;  %v691_v12 = vadd.f32 %v690_v7, %v589_v0  ;;  %v728_v13 = vadd.f32 %v720_v3, %v1282_v42  ;;  %1056 = vtanh.f32 %v734_v4 }
 0x1a6   : > { %v721_v14 = vmul.f32 %v713_v5, %v1290_v51  ;;  %v707_v17 = vmul.f32 0.044715, %v689_v6  ;;  %v735_v18 = vmul.f32 0.7978846, %v727_v8  ;;  %v697_v40 = vmul.f32 0.5, %v1290_v51 }
 0x1a7   : > { %v722_v61 = vmul.f32 %v714_v9, %v1293_v56  ;;  %v708_v19 = vmul.f32 0.044715, %v691_v12  ;;  %v736_v55 = vmul.f32 0.7978846, %v728_v13  ;;  %v699_v35 = vmul.f32 0.5, %v689_v6 }
 0x1a8   : > { %v715_v60 = vmul.f32 %v707_v17, %v689_v6  ;;  %1058 = vtanh.f32 %v735_v18  ;;  %v729_v20 = vadd.f32 %v721_v14, %v1290_v51  ;;  %v700_v59 = vmul.f32 0.5, %v691_v12  ;;  %v765_v51 = vld [vmem:[%s1345_s6] sm:$0x7] }
 0x1a9   : > { %v716_v54 = vmul.f32 %v708_v19, %v691_v12  ;;  %1060 = vtanh.f32 %v736_v55  ;;  %v730_v21 = vadd.f32 %v722_v61, %v1293_v56  ;;  %v855_v5 = vand.u32 127, %v383_v16  ;;  %v770_v56 = vpop.permute.xlu0 %769  ;;  %v846_v14 = vld [vmem:[%s346_s19] sm:$0x77] }
 0x1aa   : > { %v723_v22 = vmul.f32 %v715_v60, %v689_v6  ;;  %v737_v23 = vmul.f32 0.7978846, %v729_v20  ;;  %v857_v13 = vstv %s983_s15  ;;  %v860_v60 = vld [vmem:[#allocation2] sm:$0x77] }
 0x1ab   : > { %v724_v24 = vmul.f32 %v716_v54, %v691_v12  ;;  %v738_v25 = vmul.f32 0.7978846, %v730_v21  ;;  %v856_v9 = vadd.s32 128, %v855_v5  ;;  %v858_v18 = vadd.s32 %v857_v13, %v855_v5 }
 0x1ac   : > { %v731_v26 = vadd.f32 %v723_v22, %v689_v6  ;;  %1062 = vtanh.f32 %v737_v23 }
 0x1ad   : > { %v732_v27 = vadd.f32 %v724_v24, %v691_v12  ;;  %1064 = vtanh.f32 %v738_v25  ;;  %v859_v61 = vadd.s32 %v857_v13, %v856_v9  ;;  %vm861_vm1 = vcmp.lt.s32.totalorder %v858_v18, 256 }
 0x1ae   : > { %v1055_v28 = vpop.eup %1054  ;;  %v739_v31 = vmul.f32 0.7978846, %v731_v26 }
 0x1af   : > { %v1057_v10 = vpop.eup %1056  ;;  %v740_v11 = vmul.f32 0.7978846, %v732_v27  ;;  %v749_v29 = vadd.f32 1.0, %v1055_v28  ;;  %vm862_vm2 = vcmp.lt.s32.totalorder %v859_v61, 256 }
 0x1b0   : > { %1066 = vtanh.f32 %v739_v31  ;;  %v750_v32 = vadd.f32 1.0, %v1057_v10 }
 0x1b1   : > { %1068 = vtanh.f32 %v740_v11  ;;  %v757_v43 = vmul.f32 %v749_v29, %v693_v36 }
 0x1b2   : > { %v1059_v30 = vpop.eup %1058  ;;  %v758_v46 = vmul.f32 %v750_v32, %v694_v39 }
 0x1b3   : > { %v1061_v34 = vpop.eup %1060  ;;  %v751_v38 = vadd.f32 1.0, %v1059_v30 }
 0x1b4   : > { %v752_v41 = vadd.f32 1.0, %v1061_v34 }
 0x1b5   : > { %v759_v44 = vmul.f32 %v751_v38, %v695_v37 }
 0x1b6   : > { %v1063_v45 = vpop.eup %1062  ;;  %v760_v47 = vmul.f32 %v752_v41, %v696_v15 }
 0x1b7   : > { %v1065_v48 = vpop.eup %1064  ;;  %v996_v49 = vpack.c.bf16 %v759_v44, %v757_v43  ;;  %v753_v52 = vadd.f32 1.0, %v1063_v45 }
 0x1b8   : > { %v994_v50 = vpack.c.bf16 %v760_v47, %v758_v46  ;;  %v754_v33 = vadd.f32 1.0, %v1065_v48 }
 0x1b9   : > { %v761_v63 = vmul.f32 %v753_v52, %v697_v40 }
 0x1ba   : > { %v1067_v53 = vpop.eup %1066  ;;  %995 = vmatprep.subr.bf16.mxu1 %v994_v50  ;;  %v762_v1 = vmul.f32 %v754_v33, %v698_v58 }
 0x1bb   : > { %v1069_v57 = vpop.eup %1068  ;;  %997 = vmatpush1.bf16.msra.mxu1 %v996_v49  ;;  %v755_v42 = vadd.f32 1.0, %v1067_v53 }
 0x1bc   : > { %v756_v62 = vadd.f32 1.0, %v1069_v57 }
 0x1bd   : > { %v763_v0 = vmul.f32 %v755_v42, %v699_v35 }
 0x1be   : > { %v764_v2 = vmul.f32 %v756_v62, %v700_v59 }
 0x1bf   : > { %v1000_v3 = vpack.c.bf16 %v763_v0, %v761_v63 }
 0x1c0   : > { %v998_v4 = vpack.c.bf16 %v764_v2, %v762_v1 }
 0x1c2   : > { %999 = vmatprep.subr.bf16.mxu1 %v998_v4 }
 0x1c3   : > { %1001 = vmatpush1.bf16.msra.mxu1 %v1000_v3 }
 0x1c6   : > { %982 = vmatmul.mubr.msk.f32.vlgmr.msra.gmra.mrb[0].mxu1 %vm591_vm0, %v765_v51 }
 0x299   : > { %v841_v6 = vpop.f32.mrb[0].mxu1 }
 0x29a   : > { %v842_v7 = vadd.f32 %v841_v6, %v770_v56  ;;  %v843_v8 = vpop.f32.mrb[1].mxu1 }
 0x29b   : > { %v844_v12 = vadd.f32 %v843_v8, %v770_v56 }
 0x29d   : > { %v849_v17 = vcombine.low %v842_v7, %v844_v12 }
 0x29f   : > { %v851_v19 = vsub.f32 %v846_v14, %v849_v17 }
 0x2a1   : > { %v863_v55 = vmul.f32 %v851_v19, %v851_v19 }
 0x2a3   : > { %v869_v16 = vcombine.high %v863_v55, %v863_v55  ;;  %v871_v20 = vsel %vm861_vm1, %v863_v55, 0.0 }
 0x2a5   : > { %v872_v54 = vsel %vm862_vm2, %v869_v16, 0.0 }
 0x2a6   : > { %v875_v21 = vcombine.low %v871_v20, %v872_v54 }
 0x2a8   : > { %v877_v22 = vadd.f32 %v875_v21, %v860_v60 }
 0x2aa   : > { %878 = vst [vmem:[#allocation2] sm:$0x77] %v877_v22 }
 0x2b1   : > { %v882_v23 = vld [vmem:[#allocation2] sm:$0x77] }
 0x2b2   : > { %v884_v24 = vcombine.high %v882_v23, %v882_v23  ;;  %v887_v25 = vsel %vm886_vm3, %v882_v23, 0.0 }
 0x2b4   : > { %v888_v26 = vsel %vm886_vm3, %v884_v24, 0.0 }
 0x2b5   : > { %v889_v27 = vadd.f32 %v888_v26, %v887_v25 }
 0x2b7   : > { %890 = vadd.xlane.f32.xlu1 %v889_v27 }
 0x344   : > { %v891_v28 = vpop.xlane.xlu1 %890 }
 0x345   : > { %v892_v31 = vrot.slane %v891_v28, 4 }
 0x347   : > { %v893_v10 = vadd.f32 %v892_v31, %v891_v28 }
 0x349   : > { %v894_v11 = vrot.slane %v893_v10, 2 }
 0x34b   : > { %v895_v29 = vadd.f32 %v894_v11, %v893_v10 }
 0x34d   : > { %v896_v30 = vrot.slane %v895_v29, 1 }
 0x34f   : > { %v897_v32 = vadd.f32 %v896_v30, %v895_v29 }
 0x351   : > { %1002 = vpush %v897_v32 }
 0x382   : > { %s1003_s22 = spop %1002 }
 0x383   : > { %v899_v34 = vstv %s1003_s22 }
 0x384   : > { %901 = vst.msk [vmem:[%s351_s21] sm:$0x1] %vm900_vm4, %v899_v34 }
 0x385 PF: > { %s18_s29 = sadd.s32 1, %s1092_s29   ;;  %s1348_s27 = smov %s1088_s28 }
 0x386   : > { %p15_p6 = scmp.ge.s32.totalorder %s18_s29, 4   ;;  %s1349_s28 = smov %s1351_s30 }
 0x388   :  { %17 = sbr.rel (!%p15_p6) target bundleno = 2 (0x2), region = 93 }

</bundles_post_ra>
